<compile_context>
chip_gen: v7x
topology: tpu7x:2x2x1
jax: 0.10.0
libtpu: 0.0.40
codegen_flags: <defaults>
</compile_context>

<pallas_src>
import jax
import jax.numpy as jnp
import numpy as np
from jax.experimental import pallas as pl
from jax.experimental.pallas import tpu as pltpu

IN_DIM = 28 * 28   # 784
H1 = 256
H2 = 64


def _round_up(x, m):
    return (x + m - 1) // m * m


def _ae_kernel(x_ref,
               w1_ref, b1_ref,
               w2_ref, b2_ref,
               w3_ref, b3_ref,
               w4_ref, b4_ref,
               o_ref):
    """Fused 4-layer forward pass for one (TB, 784) batch tile.

    Matmuls: bf16 operands, f32 accumulation on the MXU.
    ReLU: f32 on the VPU.  Sigmoid: exp + approx reciprocal on the EUP.
    """
    x = x_ref[...].astype(jnp.bfloat16)                              # (TB, 784)

    # encoder
    h = jnp.dot(x, w1_ref[...], preferred_element_type=jnp.float32) + b1_ref[...]
    h = jnp.maximum(h, 0.0)                                          # (TB, 256)
    z = jnp.dot(h.astype(jnp.bfloat16), w2_ref[...],
                preferred_element_type=jnp.float32) + b2_ref[...]
    z = jnp.maximum(z, 0.0)                                          # (TB, 64)

    # decoder
    d = jnp.dot(z.astype(jnp.bfloat16), w3_ref[...],
                preferred_element_type=jnp.float32) + b3_ref[...]
    d = jnp.maximum(d, 0.0)                                          # (TB, 256)
    y = jnp.dot(d.astype(jnp.bfloat16), w4_ref[...],
                preferred_element_type=jnp.float32) + b4_ref[...]
    y = pl.reciprocal(1.0 + jnp.exp(-y), approx=True)                # sigmoid

    o_ref[...] = y.astype(o_ref.dtype)


def autoencoder_forward(x, params, *, block_b=256):
    """x: (B, 784) float32. params: f32 master weights (in,out) / biases (1,out)."""
    B = x.shape[0]
    x = x.astype(jnp.float32)

    # bf16 weights for the MXU; f32 biases for the epilogue adds.
    w1 = params["w1"].astype(jnp.bfloat16)
    w2 = params["w2"].astype(jnp.bfloat16)
    w3 = params["w3"].astype(jnp.bfloat16)
    w4 = params["w4"].astype(jnp.bfloat16)
    b1 = params["b1"].astype(jnp.float32)
    b2 = params["b2"].astype(jnp.float32)
    b3 = params["b3"].astype(jnp.float32)
    b4 = params["b4"].astype(jnp.float32)

    # Batch tile: multiple of 16 (bf16 sublane packing), capped at block_b.
    tb = min(block_b, _round_up(B, 16))
    Bp = _round_up(B, tb)
    if Bp != B:
        x = jnp.pad(x, ((0, Bp - B), (0, 0)))
    grid = (Bp // tb,)

    def tile_spec():
        return pl.BlockSpec((tb, IN_DIM), lambda i: (i, 0))

    def resident(shape):
        # Constant block index -> DMA'd once, stays VMEM-resident across steps.
        return pl.BlockSpec(shape, lambda i: (0, 0))

    # Right-sized VMEM request: resident weights/biases (double-buffered by
    # the pipeliner), double-buffered in/out tiles, f32 intermediates, headroom.
    w_bytes = 2 * (IN_DIM * H1 + H1 * H2 + H2 * H1 + H1 * IN_DIM)   # bf16
    b_bytes = 4 * (H1 + H2 + H1 + IN_DIM)                           # f32
    io_bytes = 2 * 2 * 4 * tb * IN_DIM                              # in+out, 2-buf
    interm_bytes = 3 * 4 * tb * (IN_DIM + H1 + H2 + H1)             # generous
    vmem_limit = int(2 * (w_bytes + b_bytes) + io_bytes + interm_bytes + (8 << 20))

    flops = 2 * Bp * (IN_DIM * H1 + H1 * H2 + H2 * H1 + H1 * IN_DIM)
    cost = pl.CostEstimate(
        flops=flops,
        transcendentals=Bp * IN_DIM,                                # sigmoid exp
        bytes_accessed=2 * Bp * IN_DIM * 4 + w_bytes + b_bytes,
    )

    out = pl.pallas_call(
        _ae_kernel,
        out_shape=jax.ShapeDtypeStruct((Bp, IN_DIM), jnp.float32),
        grid=grid,
        in_specs=[
            tile_spec(),
            resident((IN_DIM, H1)), resident((1, H1)),
            resident((H1, H2)),     resident((1, H2)),
            resident((H2, H1)),     resident((1, H1)),
            resident((H1, IN_DIM)), resident((1, IN_DIM)),
        ],
        out_specs=tile_spec(),
        compiler_params=pltpu.CompilerParams(
            dimension_semantics=("parallel",),
            vmem_limit_bytes=vmem_limit),
        cost_estimate=cost,
    )(x, w1, b1, w2, b2, w3, b3, w4, b4)

    return out[:B]


def init_params(key):
    """Deterministic init mimicking PyTorch nn.Linear (uniform +/- 1/sqrt(fan_in)).

    Master weights are f32, stored transposed relative to PyTorch:
    (in_features, out_features).
    """
    dims = [(IN_DIM, H1), (H1, H2), (H2, H1), (H1, IN_DIM)]
    params = {}
    keys = jax.random.split(key, 2 * len(dims))
    for i, (fan_in, fan_out) in enumerate(dims):
        bound = 1.0 / np.sqrt(fan_in)
        w = jax.random.uniform(keys[2 * i], (fan_in, fan_out),
                               minval=-bound, maxval=bound, dtype=jnp.float32)
        b = jax.random.uniform(keys[2 * i + 1], (1, fan_out),
                               minval=-bound, maxval=bound, dtype=jnp.float32)
        params[f"w{i + 1}"] = w
        params[f"b{i + 1}"] = b
    return params


def reference_forward(x, p):
    """Pure-JAX f32 reference (matches the PyTorch module's semantics)."""
    h = jnp.maximum(x @ p["w1"] + p["b1"], 0.0)
    z = jnp.maximum(h @ p["w2"] + p["b2"], 0.0)
    d = jnp.maximum(z @ p["w3"] + p["b3"], 0.0)
    return jax.nn.sigmoid(d @ p["w4"] + p["b4"])


if __name__ == "__main__":
    key = jax.random.PRNGKey(0)
    k_param, k_x = jax.random.split(key)
    params = init_params(k_param)

    # Small single-tile case (B=8, padded to one 16-row tile) and a
    # multi-tile case (B=40 with TB=16 -> grid of 3, exercises resident
    # weights across grid steps + batch padding).
    for B, blk in ((8, 256), (40, 16)):
        x = jax.random.uniform(jax.random.fold_in(k_x, B), (B, IN_DIM),
                               dtype=jnp.float32)
        out = jax.block_until_ready(autoencoder_forward(x, params, block_b=blk))
        ref = reference_forward(x, params)
        # bf16 matmul operands (f32 accumulate) -> loose-ish tolerance vs f32 ref.
        np.testing.assert_allclose(np.asarray(out), np.asarray(ref),
                                   rtol=2e-2, atol=2e-2)

    print("KERNEL_OK")
</pallas_src>

<mosaic_0001>
module attributes {stable_mosaic.version = 11 : i64} {
  func.func @_ae_kernel(%arg0: i32, %arg1: memref<16x784xf32, #tpu.memory_space<vmem>>, %arg2: memref<784x256xbf16, #tpu.memory_space<vmem>>, %arg3: memref<1x256xf32, #tpu.memory_space<vmem>>, %arg4: memref<256x64xbf16, #tpu.memory_space<vmem>>, %arg5: memref<1x64xf32, #tpu.memory_space<vmem>>, %arg6: memref<64x256xbf16, #tpu.memory_space<vmem>>, %arg7: memref<1x256xf32, #tpu.memory_space<vmem>>, %arg8: memref<256x784xbf16, #tpu.memory_space<vmem>>, %arg9: memref<1x784xf32, #tpu.memory_space<vmem>>, %arg10: memref<16x784xf32, #tpu.memory_space<vmem>>) attributes {dimension_semantics = [#tpu.dimension_semantics<parallel>], iteration_bounds = array<i64: 1>, scalar_prefetch = 0 : i64, scratch_operands = 0 : i64, tpu.core_type = #tpu.core_type<tc>, window_params = [{transform_indices = @transform_0, window_bounds = array<i64: 16, 784>}, {pipeline_mode = #tpu.pipeline_mode<synchronous>, transform_indices = @transform_1, window_bounds = array<i64: 784, 256>}, {pipeline_mode = #tpu.pipeline_mode<synchronous>, transform_indices = @transform_2, window_bounds = array<i64: 1, 256>}, {pipeline_mode = #tpu.pipeline_mode<synchronous>, transform_indices = @transform_3, window_bounds = array<i64: 256, 64>}, {pipeline_mode = #tpu.pipeline_mode<synchronous>, transform_indices = @transform_4, window_bounds = array<i64: 1, 64>}, {pipeline_mode = #tpu.pipeline_mode<synchronous>, transform_indices = @transform_5, window_bounds = array<i64: 64, 256>}, {pipeline_mode = #tpu.pipeline_mode<synchronous>, transform_indices = @transform_6, window_bounds = array<i64: 1, 256>}, {pipeline_mode = #tpu.pipeline_mode<synchronous>, transform_indices = @transform_7, window_bounds = array<i64: 256, 784>}, {pipeline_mode = #tpu.pipeline_mode<synchronous>, transform_indices = @transform_8, window_bounds = array<i64: 1, 784>}, {transform_indices = @transform_9, window_bounds = array<i64: 16, 784>}]} {
    %c0 = arith.constant 0 : index
    %c0_0 = arith.constant 0 : index
    %0 = vector.load %arg1[%c0, %c0_0] : memref<16x784xf32, #tpu.memory_space<vmem>>, vector<16x784xf32>
    %1 = arith.truncf %0 : vector<16x784xf32> to vector<16x784xbf16>
    %c0_1 = arith.constant 0 : index
    %c0_2 = arith.constant 0 : index
    %2 = vector.load %arg2[%c0_1, %c0_2] : memref<784x256xbf16, #tpu.memory_space<vmem>>, vector<784x256xbf16>
    %cst = arith.constant dense<0.000000e+00> : vector<16x256xf32>
    %3 = tpu.matmul %1, %2, %cst {dimension_numbers = #tpu.dot_dimension_numbers<[1], [0], [0], [1], [0, 0, 1, 1], [], []>} : vector<16x784xbf16>, vector<784x256xbf16>, vector<16x256xf32> -> vector<16x256xf32>
    %c0_3 = arith.constant 0 : index
    %c0_4 = arith.constant 0 : index
    %4 = vector.load %arg3[%c0_3, %c0_4] : memref<1x256xf32, #tpu.memory_space<vmem>>, vector<1x256xf32>
    %5 = vector.broadcast %4 : vector<1x256xf32> to vector<16x256xf32>
    %6 = arith.addf %3, %5 : vector<16x256xf32>
    %cst_5 = arith.constant 0.000000e+00 : f32
    %7 = vector.broadcast %cst_5 : f32 to vector<16x256xf32>
    %8 = arith.maximumf %6, %7 : vector<16x256xf32>
    %9 = arith.truncf %8 : vector<16x256xf32> to vector<16x256xbf16>
    %c0_6 = arith.constant 0 : index
    %c0_7 = arith.constant 0 : index
    %10 = vector.load %arg4[%c0_6, %c0_7] : memref<256x64xbf16, #tpu.memory_space<vmem>>, vector<256x64xbf16>
    %cst_8 = arith.constant dense<0.000000e+00> : vector<16x64xf32>
    %11 = tpu.matmul %9, %10, %cst_8 {dimension_numbers = #tpu.dot_dimension_numbers<[1], [0], [0], [1], [0, 0, 1, 1], [], []>} : vector<16x256xbf16>, vector<256x64xbf16>, vector<16x64xf32> -> vector<16x64xf32>
    %c0_9 = arith.constant 0 : index
    %c0_10 = arith.constant 0 : index
    %12 = vector.load %arg5[%c0_9, %c0_10] : memref<1x64xf32, #tpu.memory_space<vmem>>, vector<1x64xf32>
    %13 = vector.broadcast %12 : vector<1x64xf32> to vector<16x64xf32>
    %14 = arith.addf %11, %13 : vector<16x64xf32>
    %cst_11 = arith.constant 0.000000e+00 : f32
    %15 = vector.broadcast %cst_11 : f32 to vector<16x64xf32>
    %16 = arith.maximumf %14, %15 : vector<16x64xf32>
    %17 = arith.truncf %16 : vector<16x64xf32> to vector<16x64xbf16>
    %c0_12 = arith.constant 0 : index
    %c0_13 = arith.constant 0 : index
    %18 = vector.load %arg6[%c0_12, %c0_13] : memref<64x256xbf16, #tpu.memory_space<vmem>>, vector<64x256xbf16>
    %cst_14 = arith.constant dense<0.000000e+00> : vector<16x256xf32>
    %19 = tpu.matmul %17, %18, %cst_14 {dimension_numbers = #tpu.dot_dimension_numbers<[1], [0], [0], [1], [0, 0, 1, 1], [], []>} : vector<16x64xbf16>, vector<64x256xbf16>, vector<16x256xf32> -> vector<16x256xf32>
    %c0_15 = arith.constant 0 : index
    %c0_16 = arith.constant 0 : index
    %20 = vector.load %arg7[%c0_15, %c0_16] : memref<1x256xf32, #tpu.memory_space<vmem>>, vector<1x256xf32>
    %21 = vector.broadcast %20 : vector<1x256xf32> to vector<16x256xf32>
    %22 = arith.addf %19, %21 : vector<16x256xf32>
    %cst_17 = arith.constant 0.000000e+00 : f32
    %23 = vector.broadcast %cst_17 : f32 to vector<16x256xf32>
    %24 = arith.maximumf %22, %23 : vector<16x256xf32>
    %25 = arith.truncf %24 : vector<16x256xf32> to vector<16x256xbf16>
    %c0_18 = arith.constant 0 : index
    %c0_19 = arith.constant 0 : index
    %26 = vector.load %arg8[%c0_18, %c0_19] : memref<256x784xbf16, #tpu.memory_space<vmem>>, vector<256x784xbf16>
    %cst_20 = arith.constant dense<0.000000e+00> : vector<16x784xf32>
    %27 = tpu.matmul %25, %26, %cst_20 {dimension_numbers = #tpu.dot_dimension_numbers<[1], [0], [0], [1], [0, 0, 1, 1], [], []>} : vector<16x256xbf16>, vector<256x784xbf16>, vector<16x784xf32> -> vector<16x784xf32>
    %c0_21 = arith.constant 0 : index
    %c0_22 = arith.constant 0 : index
    %28 = vector.load %arg9[%c0_21, %c0_22] : memref<1x784xf32, #tpu.memory_space<vmem>>, vector<1x784xf32>
    %29 = vector.broadcast %28 : vector<1x784xf32> to vector<16x784xf32>
    %30 = arith.addf %27, %29 : vector<16x784xf32>
    %cst_23 = arith.constant 0.000000e+00 : f32
    %31 = vector.broadcast %cst_23 : f32 to vector<16x784xf32>
    %32 = arith.subf %31, %30 : vector<16x784xf32>
    %33 = math.exp %32 : vector<16x784xf32>
    %cst_24 = arith.constant 1.000000e+00 : f32
    %34 = vector.broadcast %cst_24 : f32 to vector<16x784xf32>
    %35 = arith.addf %34, %33 : vector<16x784xf32>
    %36 = tpu.reciprocal %35 {approx = true} : vector<16x784xf32> -> vector<16x784xf32>
    %c0_25 = arith.constant 0 : index
    %c0_26 = arith.constant 0 : index
    %37 = vector.load %arg10[%c0_25, %c0_26] : memref<16x784xf32, #tpu.memory_space<vmem>>, vector<16x784xf32>
    tpu.vector_store %arg10[%c0_25, %c0_26], %36 {strides = array<i32>} : memref<16x784xf32, #tpu.memory_space<vmem>>, vector<16x784xf32>,
    return
  }
  func.func @transform_0(%arg0: i32) -> (i32, i32) {
    %c0_i32 = arith.constant 0 : i32
    %c0_i32_0 = arith.constant 0 : i32
    return %arg0, %c0_i32 : i32, i32
  }
  func.func @transform_1(%arg0: i32) -> (i32, i32) {
    %c0_i32 = arith.constant 0 : i32
    %c0_i32_0 = arith.constant 0 : i32
    %c0_i32_1 = arith.constant 0 : i32
    return %c0_i32, %c0_i32_0 : i32, i32
  }
  func.func @transform_2(%arg0: i32) -> (i32, i32) {
    %c0_i32 = arith.constant 0 : i32
    %c0_i32_0 = arith.constant 0 : i32
    %c0_i32_1 = arith.constant 0 : i32
    return %c0_i32, %c0_i32_0 : i32, i32
  }
  func.func @transform_3(%arg0: i32) -> (i32, i32) {
    %c0_i32 = arith.constant 0 : i32
    %c0_i32_0 = arith.constant 0 : i32
    %c0_i32_1 = arith.constant 0 : i32
    return %c0_i32, %c0_i32_0 : i32, i32
  }
  func.func @transform_4(%arg0: i32) -> (i32, i32) {
    %c0_i32 = arith.constant 0 : i32
    %c0_i32_0 = arith.constant 0 : i32
    %c0_i32_1 = arith.constant 0 : i32
    return %c0_i32, %c0_i32_0 : i32, i32
  }
  func.func @transform_5(%arg0: i32) -> (i32, i32) {
    %c0_i32 = arith.constant 0 : i32
    %c0_i32_0 = arith.constant 0 : i32
    %c0_i32_1 = arith.constant 0 : i32
    return %c0_i32, %c0_i32_0 : i32, i32
  }
  func.func @transform_6(%arg0: i32) -> (i32, i32) {
    %c0_i32 = arith.constant 0 : i32
    %c0_i32_0 = arith.constant 0 : i32
    %c0_i32_1 = arith.constant 0 : i32
    return %c0_i32, %c0_i32_0 : i32, i32
  }
  func.func @transform_7(%arg0: i32) -> (i32, i32) {
    %c0_i32 = arith.constant 0 : i32
    %c0_i32_0 = arith.constant 0 : i32
    %c0_i32_1 = arith.constant 0 : i32
    return %c0_i32, %c0_i32_0 : i32, i32
  }
  func.func @transform_8(%arg0: i32) -> (i32, i32) {
    %c0_i32 = arith.constant 0 : i32
    %c0_i32_0 = arith.constant 0 : i32
    %c0_i32_1 = arith.constant 0 : i32
    return %c0_i32, %c0_i32_0 : i32, i32
  }
  func.func @transform_9(%arg0: i32) -> (i32, i32) {
    %c0_i32 = arith.constant 0 : i32
    %c0_i32_0 = arith.constant 0 : i32
    return %arg0, %c0_i32 : i32, i32
  }
}

</mosaic_0001>

<bundles_post_ra>
// kernel: tpu_custom_call.1
= control target key start
LH: loop header
LB: loop body
LE: loop exit
PB: predicated region body
PF: predicated region fallthrough
CT: control target
= control target key end

     0   :  { %s3721_s0 = inlined_call_operand.vmem [shape: f32[16,784], index: 0, kind: input, shape index: {}]   ;;  %s3722_s1 = inlined_call_operand.vmem [shape: bf16[784,256], index: 1, kind: input, shape index: {}]   ;;  %s3723_s2 = inlined_call_operand.vmem [shape: f32[1,256], index: 2, kind: input, shape index: {}]   ;;  %s3724_s3 = inlined_call_operand.vmem [shape: bf16[256,64], index: 3, kind: input, shape index: {}]   ;;  %s3725_s4 = inlined_call_operand.vmem [shape: f32[1,64], index: 4, kind: input, shape index: {}]   ;;  %s3726_s5 = inlined_call_operand.vmem [shape: bf16[64,256], index: 5, kind: input, shape index: {}]   ;;  %s3727_s6 = inlined_call_operand.vmem [shape: f32[1,256], index: 6, kind: input, shape index: {}]   ;;  %s3728_s7 = inlined_call_operand.vmem [shape: bf16[256,784], index: 7, kind: input, shape index: {}]   ;;  %s3729_s8 = inlined_call_operand.vmem [shape: f32[1,784], index: 8, kind: input, shape index: {}]   ;;  %s3730_s9 = inlined_call_operand.hbm [shape: f32[16,784], index: 9, kind: output, shape index: {}]  }
   0x1   :  { %v2441_v0 = vld [vmem:[%s3722_s1 + $0x4] ss:$8 sps:$4 sm:$0xff]   ;;  %v2443_v1 = vld [vmem:[%s3722_s1] ss:$8 sps:$4 sm:$0xff]   ;;  %v2444_v2 = vld [vmem:[%s3722_s1 + $0x14] ss:$8 sps:$4 sm:$0xff]  }
   0x2   :  { %659 = vmatprep.subr.bf16.mxu0 %v2441_v0  ;;  %v2446_v3 = vld [vmem:[%s3722_s1 + $0x10] ss:$8 sps:$4 sm:$0xff]   ;;  %v2447_v4 = vld [vmem:[%s3722_s1 + $0x24] ss:$8 sps:$4 sm:$0xff]   ;;  %v2449_v5 = vld [vmem:[%s3722_s1 + $0x20] ss:$8 sps:$4 sm:$0xff]  }
   0x3   :  { %660 = vmatpush1.bf16.msra.mxu0 %v2443_v1  ;;  %v2450_v6 = vld [vmem:[%s3722_s1 + $0x34] ss:$8 sps:$4 sm:$0xff]   ;;  %v2452_v7 = vld [vmem:[%s3722_s1 + $0x30] ss:$8 sps:$4 sm:$0xff]   ;;  %v2453_v8 = vld [vmem:[%s3722_s1 + $0x44] ss:$8 sps:$4 sm:$0xff]  }
   0x4   :  { %661 = vmatprep.subr.bf16.mxu0 %v2444_v2  ;;  %v2455_v9 = vld [vmem:[%s3722_s1 + $0x40] ss:$8 sps:$4 sm:$0xff]   ;;  %v2456_v10 = vld [vmem:[%s3722_s1 + $0x54] ss:$8 sps:$4 sm:$0xff]   ;;  %v2458_v11 = vld [vmem:[%s3722_s1 + $0x50] ss:$8 sps:$4 sm:$0xff]  }
   0x5   :  { %v2459_v12 = vld [vmem:[%s3722_s1 + $0x64] ss:$8 sps:$4 sm:$0xff]   ;;  %v2461_v16 = vld [vmem:[%s3722_s1 + $0x60] ss:$8 sps:$4 sm:$0xff]   ;;  %v2462_v17 = vld [vmem:[%s3722_s1 + $0x74] ss:$8 sps:$4 sm:$0xff]  }
   0x6   :  { %v35_v13 = vld [vmem:[%s3721_s0 + $0x8] sm:$0xff]  ;;  %v42_v14 = vld [vmem:[%s3721_s0 + $0x40] sm:$0xff]  ;;  %v2464_v18 = vld [vmem:[%s3722_s1 + $0x70] ss:$8 sps:$4 sm:$0xff]  }
   0x7   :  { %662 = vmatpush1.bf16.msra.mxu0 %v2446_v3  ;;  %v49_v15 = vpack.c.bf16 %v42_v14, %v35_v13  ;;  %v2465_v19 = vld [vmem:[%s3722_s1 + $0x84] ss:$8 sps:$4 sm:$0xff]   ;;  %v2467_v20 = vld [vmem:[%s3722_s1 + $0x80] ss:$8 sps:$4 sm:$0xff]   ;;  %v2468_v21 = vld [vmem:[%s3722_s1 + $0x94] ss:$8 sps:$4 sm:$0xff]  }
   0x8   :  { %663 = vmatprep.subr.bf16.mxu0 %v2447_v4  ;;  %v2470_v22 = vld [vmem:[%s3722_s1 + $0x90] ss:$8 sps:$4 sm:$0xff]   ;;  %v2471_v23 = vld [vmem:[%s3722_s1 + $0xa4] ss:$8 sps:$4 sm:$0xff]   ;;  %v2473_v24 = vld [vmem:[%s3722_s1 + $0xa0] ss:$8 sps:$4 sm:$0xff]  }
   0x9   :  { %691 = vmatprep.mubr.bf16.mxu0 %v49_v15  ;;  %v2474_v25 = vld [vmem:[%s3722_s1 + $0xb4] ss:$8 sps:$4 sm:$0xff]   ;;  %v2476_v26 = vld [vmem:[%s3722_s1 + $0xb0] ss:$8 sps:$4 sm:$0xff]   ;;  %v2477_v27 = vld [vmem:[%s3722_s1 + $0xc4] ss:$8 sps:$4 sm:$0xff]  }
   0xa   :  { %v2479_v28 = vld [vmem:[%s3722_s1 + $0xc0] ss:$8 sps:$4 sm:$0xff]   ;;  %v2480_v29 = vld [vmem:[%s3722_s1 + $0xd4] ss:$8 sps:$4 sm:$0xff]   ;;  %v2482_v30 = vld [vmem:[%s3722_s1 + $0xd0] ss:$8 sps:$4 sm:$0xff]  }
   0xb   :  { %664 = vmatpush1.bf16.msra.mxu0 %v2449_v5  ;;  %v2483_v31 = vld [vmem:[%s3722_s1 + $0xe4] ss:$8 sps:$4 sm:$0xff]   ;;  %v2485_v32 = vld [vmem:[%s3722_s1 + $0xe0] ss:$8 sps:$4 sm:$0xff]   ;;  %v2486_v33 = vld [vmem:[%s3722_s1 + $0xf4] ss:$8 sps:$4 sm:$0xff]  }
   0xc   :  { %665 = vmatprep.subr.bf16.mxu0 %v2450_v6  ;;  %v2488_v34 = vld [vmem:[%s3722_s1 + $0xf0] ss:$8 sps:$4 sm:$0xff]   ;;  %v2491_v35 = vld [vmem:[%s3722_s1 + $0x104] ss:$8 sps:$4 sm:$0xff]   ;;  %v2489_v41 = vld [vmem:[%s3722_s1 + $0x100] ss:$8 sps:$4 sm:$0xff]  }
   0xd   :  { %v34_v36 = vld [vmem:[%s3721_s0] sm:$0xff]  ;;  %v41_v37 = vld [vmem:[%s3721_s0 + $0x38] sm:$0xff]  ;;  %v44_v39 = vld [vmem:[%s3721_s0 + $0x50] sm:$0xff] }
   0xe   :  { %v37_v38 = vld [vmem:[%s3721_s0 + $0x18] sm:$0xff]  ;;  %v48_v40 = vpack.c.bf16 %v41_v37, %v34_v36  ;;  %v2497_v45 = vld [vmem:[%s3722_s1 + $0x124] ss:$8 sps:$4 sm:$0xff]   ;;  %v2495_v46 = vld [vmem:[%s3722_s1 + $0x120] ss:$8 sps:$4 sm:$0xff]  }
   0xf   :  { %666 = vmatpush1.bf16.msra.mxu0 %v2452_v7  ;;  %v51_v42 = vpack.c.bf16 %v44_v39, %v37_v38  ;;  %v2494_v43 = vld [vmem:[%s3722_s1 + $0x114] ss:$8 sps:$4 sm:$0xff]   ;;  %v2492_v44 = vld [vmem:[%s3722_s1 + $0x110] ss:$8 sps:$4 sm:$0xff]   ;;  %v2503_v49 = vld [vmem:[%s3722_s1 + $0x144] ss:$8 sps:$4 sm:$0xff]  }
  0x10   :  { %667 = vmatprep.subr.bf16.mxu0 %v2453_v8  ;;  %v2500_v47 = vld [vmem:[%s3722_s1 + $0x134] ss:$8 sps:$4 sm:$0xff]   ;;  %v2498_v48 = vld [vmem:[%s3722_s1 + $0x130] ss:$8 sps:$4 sm:$0xff]   ;;  %v2588_v50 = vld [vmem:[%s3724_s3 + $0x40] sm:$0xff]  }
  0x11   :  { %v2589_v51 = vld [vmem:[%s3724_s3] sm:$0xff]   ;;  %v2590_v52 = vld [vmem:[%s3724_s3 + $0x48] sm:$0xff]   ;;  %v2506_v54 = vld [vmem:[%s3722_s1 + $0x154] ss:$8 sps:$4 sm:$0xff]   ;;  %2377 = vmatprep.subr.bf16.mxu1 %v2588_v50 }
  0x12   :  { %v2501_v53 = vld [vmem:[%s3722_s1 + $0x140] ss:$8 sps:$4 sm:$0xff]   ;;  %v2504_v55 = vld [vmem:[%s3722_s1 + $0x150] ss:$8 sps:$4 sm:$0xff]   ;;  %2378 = vmatpush3.bf16.msra.mxu1 %v2589_v51  ;;  %v2509_v58 = vld [vmem:[%s3722_s1 + $0x164] ss:$8 sps:$4 sm:$0xff]  }
  0x13   :  { %668 = vmatpush1.bf16.msra.mxu0 %v2455_v9  ;;  %v2591_v56 = vld [vmem:[%s3724_s3 + $0x8] sm:$0xff]   ;;  %v2592_v57 = vld [vmem:[%s3724_s3 + $0x50] sm:$0xff]   ;;  %2379 = vmatprep.subr.bf16.mxu1 %v2590_v52  ;;  %v2594_v60 = vld [vmem:[%s3724_s3 + $0x58] sm:$0xff]  }
  0x14   :  { %669 = vmatprep.subr.bf16.mxu0 %v2456_v10  ;;  %v2593_v59 = vld [vmem:[%s3724_s3 + $0x10] sm:$0xff]   ;;  %v2507_v61 = vld [vmem:[%s3722_s1 + $0x160] ss:$8 sps:$4 sm:$0xff]   ;;  %v2595_v63 = vld [vmem:[%s3724_s3 + $0x18] sm:$0xff]  }
  0x15   :  { %v2512_v62 = vld [vmem:[%s3722_s1 + $0x174] ss:$8 sps:$4 sm:$0xff]   ;;  %v2596_v0 = vld [vmem:[%s3724_s3 + $0x60] sm:$0xff]   ;;  %v2510_v1 = vld [vmem:[%s3722_s1 + $0x170] ss:$8 sps:$4 sm:$0xff]  }
  0x16   :  { %2380 = vmatpush3.bf16.msra.mxu1 %v2591_v56  ;;  %v2515_v2 = vld [vmem:[%s3722_s1 + $0x184] ss:$8 sps:$4 sm:$0xff]   ;;  %v2513_v5 = vld [vmem:[%s3722_s1 + $0x180] ss:$8 sps:$4 sm:$0xff]   ;;  %v2518_v6 = vld [vmem:[%s3722_s1 + $0x194] ss:$8 sps:$4 sm:$0xff]  }
  0x17   :  { %670 = vmatpush1.bf16.msra.mxu0 %v2458_v11  ;;  %2381 = vmatprep.subr.bf16.mxu1 %v2592_v57  ;;  %v2597_v3 = vld [vmem:[%s3724_s3 + $0x20] sm:$0xff]   ;;  %v2598_v4 = vld [vmem:[%s3724_s3 + $0x68] sm:$0xff]   ;;  %v2516_v7 = vld [vmem:[%s3722_s1 + $0x190] ss:$8 sps:$4 sm:$0xff]  }
  0x18   :  { %671 = vmatprep.subr.bf16.mxu0 %v2459_v12  ;;  %v2521_v8 = vld [vmem:[%s3722_s1 + $0x1a4] ss:$8 sps:$4 sm:$0xff]   ;;  %v2519_v9 = vld [vmem:[%s3722_s1 + $0x1a0] ss:$8 sps:$4 sm:$0xff]   ;;  %v2524_v10 = vld [vmem:[%s3722_s1 + $0x1b4] ss:$8 sps:$4 sm:$0xff]  }
  0x19   :  { %v2522_v11 = vld [vmem:[%s3722_s1 + $0x1b0] ss:$8 sps:$4 sm:$0xff]   ;;  %v2527_v12 = vld [vmem:[%s3722_s1 + $0x1c4] ss:$8 sps:$4 sm:$0xff]   ;;  %v2525_v13 = vld [vmem:[%s3722_s1 + $0x1c0] ss:$8 sps:$4 sm:$0xff]  }
  0x1a   :  { %2382 = vmatpush3.bf16.msra.mxu1 %v2593_v59  ;;  %v2530_v14 = vld [vmem:[%s3722_s1 + $0x1d4] ss:$8 sps:$4 sm:$0xff]   ;;  %v2528_v15 = vld [vmem:[%s3722_s1 + $0x1d0] ss:$8 sps:$4 sm:$0xff]  }
  0x1b   :  { %672 = vmatpush1.bf16.msra.mxu0 %v2461_v16  ;;  %2383 = vmatprep.subr.bf16.mxu1 %v2594_v60  ;;  %v2533_v16 = vld [vmem:[%s3722_s1 + $0x1e4] ss:$8 sps:$4 sm:$0xff]  }
  0x1c   :  { %673 = vmatprep.subr.bf16.mxu0 %v2462_v17  ;;  %v2531_v17 = vld [vmem:[%s3722_s1 + $0x1e0] ss:$8 sps:$4 sm:$0xff]  }
  0x1e   :  { %2384 = vmatpush3.bf16.msra.mxu1 %v2595_v63 }
  0x1f   :  { %674 = vmatpush1.bf16.msra.mxu0 %v2464_v18  ;;  %2385 = vmatprep.subr.bf16.mxu1 %v2596_v0  ;;  %v2536_v18 = vld [vmem:[%s3722_s1 + $0x1f4] ss:$8 sps:$4 sm:$0xff]  }
  0x20   :  { %675 = vmatprep.subr.bf16.mxu0 %v2465_v19  ;;  %v2534_v19 = vld [vmem:[%s3722_s1 + $0x1f0] ss:$8 sps:$4 sm:$0xff]  }
  0x22   :  { %2386 = vmatpush3.bf16.msra.mxu1 %v2597_v3 }
  0x23   :  { %676 = vmatpush1.bf16.msra.mxu0 %v2467_v20  ;;  %2387 = vmatprep.subr.bf16.mxu1 %v2598_v4  ;;  %v36_v20 = vld [vmem:[%s3721_s0 + $0x10] sm:$0xff] }
  0x24   :  { %677 = vmatprep.subr.bf16.mxu0 %v2468_v21  ;;  %v43_v21 = vld [vmem:[%s3721_s0 + $0x48] sm:$0xff] }
  0x27   :  { %678 = vmatpush1.bf16.msra.mxu0 %v2470_v22  ;;  %v2539_v22 = vld [vmem:[%s3722_s1 + $0x204] ss:$8 sps:$4 sm:$0xff]  }
  0x28   :  { %679 = vmatprep.subr.bf16.mxu0 %v2471_v23  ;;  %v39_v23 = vld [vmem:[%s3721_s0 + $0x28] sm:$0xff] }
  0x2b   :  { %680 = vmatpush1.bf16.msra.mxu0 %v2473_v24  ;;  %v46_v24 = vld [vmem:[%s3721_s0 + $0x60] sm:$0xff] }
  0x2c   :  { %681 = vmatprep.subr.bf16.mxu0 %v2474_v25  ;;  %v2537_v25 = vld [vmem:[%s3722_s1 + $0x200] ss:$8 sps:$4 sm:$0xff]  }
  0x2f   :  { %682 = vmatpush1.bf16.msra.mxu0 %v2476_v26  ;;  %v50_v26 = vpack.c.bf16 %v43_v21, %v36_v20 }
  0x30   :  { %683 = vmatprep.subr.bf16.mxu0 %v2477_v27  ;;  %v2542_v27 = vld [vmem:[%s3722_s1 + $0x214] ss:$8 sps:$4 sm:$0xff]  }
  0x33   :  { %684 = vmatpush1.bf16.msra.mxu0 %v2479_v28  ;;  %v53_v28 = vpack.c.bf16 %v46_v24, %v39_v23 }
  0x34   :  { %685 = vmatprep.subr.bf16.mxu0 %v2480_v29 }
  0x37   :  { %686 = vmatpush1.bf16.msra.mxu0 %v2482_v30 }
  0x38   :  { %687 = vmatprep.subr.bf16.mxu0 %v2483_v31 }
  0x3b   :  { %688 = vmatpush1.bf16.msra.mxu0 %v2485_v32 }
  0x3c   :  { %689 = vmatprep.subr.bf16.mxu0 %v2486_v33 }
  0x3f   :  { %690 = vmatpush1.bf16.msra.mxu0 %v2488_v34 }
  0x40   :  { %702 = vmatprep.subr.bf16.mxu0 %v2491_v35 }
  0x42   :  { %692 = vmatmul.mubr.bf16.vlgmr.msra.gmra.mrb[0].mxu0 %v48_v40 }
  0x43   :  { %703 = vmatpush1.bf16.msra.mxu0 %v2489_v41  ;;  %734 = vmatprep.mubr.bf16.mxu0 %v51_v42 }
  0x44   :  { %704 = vmatprep.subr.bf16.mxu0 %v2494_v43 }
  0x47   :  { %705 = vmatpush1.bf16.msra.mxu0 %v2492_v44 }
  0x48   :  { %706 = vmatprep.subr.bf16.mxu0 %v2497_v45 }
  0x4b   :  { %707 = vmatpush1.bf16.msra.mxu0 %v2495_v46 }
  0x4c   :  { %708 = vmatprep.subr.bf16.mxu0 %v2500_v47 }
  0x4f   :  { %709 = vmatpush1.bf16.msra.mxu0 %v2498_v48 }
  0x50   :  { %710 = vmatprep.subr.bf16.mxu0 %v2503_v49 }
  0x53   :  { %711 = vmatpush1.bf16.msra.mxu0 %v2501_v53 }
  0x54   :  { %712 = vmatprep.subr.bf16.mxu0 %v2506_v54 }
  0x57   :  { %713 = vmatpush1.bf16.msra.mxu0 %v2504_v55 }
  0x58   :  { %714 = vmatprep.subr.bf16.mxu0 %v2509_v58 }
  0x5b   :  { %715 = vmatpush1.bf16.msra.mxu0 %v2507_v61 }
  0x5c   :  { %716 = vmatprep.subr.bf16.mxu0 %v2512_v62 }
  0x5f   :  { %717 = vmatpush1.bf16.msra.mxu0 %v2510_v1 }
  0x60   :  { %718 = vmatprep.subr.bf16.mxu0 %v2515_v2 }
  0x63   :  { %719 = vmatpush1.bf16.msra.mxu0 %v2513_v5 }
  0x64   :  { %720 = vmatprep.subr.bf16.mxu0 %v2518_v6 }
  0x67   :  { %721 = vmatpush1.bf16.msra.mxu0 %v2516_v7 }
  0x68   :  { %722 = vmatprep.subr.bf16.mxu0 %v2521_v8 }
  0x6b   :  { %723 = vmatpush1.bf16.msra.mxu0 %v2519_v9 }
  0x6c   :  { %724 = vmatprep.subr.bf16.mxu0 %v2524_v10 }
  0x6f   :  { %725 = vmatpush1.bf16.msra.mxu0 %v2522_v11 }
  0x70   :  { %726 = vmatprep.subr.bf16.mxu0 %v2527_v12 }
  0x73   :  { %727 = vmatpush1.bf16.msra.mxu0 %v2525_v13 }
  0x74   :  { %728 = vmatprep.subr.bf16.mxu0 %v2530_v14 }
  0x77   :  { %729 = vmatpush1.bf16.msra.mxu0 %v2528_v15 }
  0x78   :  { %730 = vmatprep.subr.bf16.mxu0 %v2533_v16 }
  0x7b   :  { %731 = vmatpush1.bf16.msra.mxu0 %v2531_v17 }
  0x7c   :  { %732 = vmatprep.subr.bf16.mxu0 %v2536_v18 }
  0x7f   :  { %733 = vmatpush1.bf16.msra.mxu0 %v2534_v19 }
  0x80   :  { %745 = vmatprep.subr.bf16.mxu0 %v2539_v22 }
  0x82   :  { %735 = vmatmul.mubr.bf16.vlgmr.msra.gmra.mrb[0].mxu0 %v50_v26 }
  0x83   :  { %14 = vsyncpa [#allocation3], 0  ;;  %746 = vmatpush1.bf16.msra.mxu0 %v2537_v25  ;;  %v2540_v29 = vld [vmem:[%s3722_s1 + $0x210] ss:$8 sps:$4 sm:$0xff]   ;;  %777 = vmatprep.mubr.bf16.mxu0 %v53_v28  ;;  %v2545_v30 = vld [vmem:[%s3722_s1 + $0x224] ss:$8 sps:$4 sm:$0xff]   ;;  %v155_v9 = vlaneseq }
  0x84   :  { %747 = vmatprep.subr.bf16.mxu0 %v2542_v27  ;;  %v2543_v31 = vld [vmem:[%s3722_s1 + $0x220] ss:$8 sps:$4 sm:$0xff]   ;;  %v2548_v32 = vld [vmem:[%s3722_s1 + $0x234] ss:$8 sps:$4 sm:$0xff]   ;;  %v2546_v33 = vld [vmem:[%s3722_s1 + $0x230] ss:$8 sps:$4 sm:$0xff]  }
  0x85   :  { %v2551_v34 = vld [vmem:[%s3722_s1 + $0x244] ss:$8 sps:$4 sm:$0xff]   ;;  %v2549_v35 = vld [vmem:[%s3722_s1 + $0x240] ss:$8 sps:$4 sm:$0xff]   ;;  %v2554_v36 = vld [vmem:[%s3722_s1 + $0x254] ss:$8 sps:$4 sm:$0xff]  }
  0x86   :  { %v2552_v37 = vld [vmem:[%s3722_s1 + $0x250] ss:$8 sps:$4 sm:$0xff]   ;;  %v2557_v38 = vld [vmem:[%s3722_s1 + $0x264] ss:$8 sps:$4 sm:$0xff]   ;;  %v2555_v39 = vld [vmem:[%s3722_s1 + $0x260] ss:$8 sps:$4 sm:$0xff]  }
  0x87   :  { %748 = vmatpush1.bf16.msra.mxu0 %v2540_v29  ;;  %v2560_v40 = vld [vmem:[%s3722_s1 + $0x274] ss:$8 sps:$4 sm:$0xff]   ;;  %v2558_v41 = vld [vmem:[%s3722_s1 + $0x270] ss:$8 sps:$4 sm:$0xff]   ;;  %v2563_v42 = vld [vmem:[%s3722_s1 + $0x284] ss:$8 sps:$4 sm:$0xff]  }
  0x88   :  { %749 = vmatprep.subr.bf16.mxu0 %v2545_v30  ;;  %v2561_v43 = vld [vmem:[%s3722_s1 + $0x280] ss:$8 sps:$4 sm:$0xff]   ;;  %v2566_v44 = vld [vmem:[%s3722_s1 + $0x294] ss:$8 sps:$4 sm:$0xff]   ;;  %v2564_v45 = vld [vmem:[%s3722_s1 + $0x290] ss:$8 sps:$4 sm:$0xff]  }
  0x89   :  { %v2569_v46 = vld [vmem:[%s3722_s1 + $0x2a4] ss:$8 sps:$4 sm:$0xff]   ;;  %v2567_v47 = vld [vmem:[%s3722_s1 + $0x2a0] ss:$8 sps:$4 sm:$0xff]   ;;  %v2572_v48 = vld [vmem:[%s3722_s1 + $0x2b4] ss:$8 sps:$4 sm:$0xff]  }
  0x8a   :  { %v2570_v49 = vld [vmem:[%s3722_s1 + $0x2b0] ss:$8 sps:$4 sm:$0xff]   ;;  %v2575_v50 = vld [vmem:[%s3722_s1 + $0x2c4] ss:$8 sps:$4 sm:$0xff]   ;;  %v2573_v51 = vld [vmem:[%s3722_s1 + $0x2c0] ss:$8 sps:$4 sm:$0xff]  }
  0x8b   :  { %750 = vmatpush1.bf16.msra.mxu0 %v2543_v31  ;;  %v2578_v52 = vld [vmem:[%s3722_s1 + $0x2d4] ss:$8 sps:$4 sm:$0xff]   ;;  %v2576_v53 = vld [vmem:[%s3722_s1 + $0x2d0] ss:$8 sps:$4 sm:$0xff]   ;;  %v2581_v54 = vld [vmem:[%s3722_s1 + $0x2e4] ss:$8 sps:$4 sm:$0xff]  }
  0x8c   :  { %751 = vmatprep.subr.bf16.mxu0 %v2548_v32  ;;  %v2579_v55 = vld [vmem:[%s3722_s1 + $0x2e0] ss:$8 sps:$4 sm:$0xff]   ;;  %v2584_v56 = vld [vmem:[%s3722_s1 + $0x2f4] ss:$8 sps:$4 sm:$0xff]   ;;  %v2582_v57 = vld [vmem:[%s3722_s1 + $0x2f0] ss:$8 sps:$4 sm:$0xff]  }
  0x8d   :  { %v38_v58 = vld [vmem:[%s3721_s0 + $0x20] sm:$0xff]  ;;  %v45_v59 = vld [vmem:[%s3721_s0 + $0x58] sm:$0xff]  ;;  %v2856_v63 = vmov 0   ;;  %v40_v0 = vld [vmem:[%s3721_s0 + $0x30] sm:$0xff]  ;;  %vm655_vm0 = vcmask 130048   ;;  %v3298_v10 = vshrl.u32 %v155_v9, 7 }
  0x8e   :  { %v2587_v60 = vld [vmem:[%s3722_s1 + $0x304] ss:$8 sps:$4 sm:$0xff]   ;;  %v52_v61 = vpack.c.bf16 %v45_v59, %v38_v58  ;;  %v2585_v62 = vld [vmem:[%s3722_s1 + $0x300] ss:$8 sps:$4 sm:$0xff]   ;;  %v2600_v4 = vld [vmem:[%s3724_s3 + $0x70] sm:$0xff]   ;;  %vm1076_vm1 = vcmask 523264  }
  0x8f   :  { %752 = vmatpush1.bf16.msra.mxu0 %v2546_v33  ;;  %v47_v1 = vld [vmem:[%s3721_s0 + $0x68] sm:$0xff]  ;;  %v2601_v5 = vld [vmem:[%s3724_s3 + $0x30] sm:$0xff]   ;;  %v2602_v6 = vld [vmem:[%s3724_s3 + $0x78] sm:$0xff]   ;;  %v3301_v11 = vsub.s32 0, %v3298_v10  ;;  %v3307_v13 = vsub.s32 1, %v3298_v10 }
  0x90   :  { %753 = vmatprep.subr.bf16.mxu0 %v2551_v34  ;;  %v54_v2 = vpack.c.bf16 %v47_v1, %v40_v0  ;;  %v2599_v3 = vld [vmem:[%s3724_s3 + $0x28] sm:$0xff]   ;;  %v2603_v7 = vld [vmem:[%s3724_s3 + $0x38] sm:$0xff]   ;;  %v153_v12 = vld [vmem:[%s3723_s2] sm:$0x3] }
  0x91   :  { %2388 = vmatpush3.bf16.msra.mxu1 %v2599_v3  ;;  %v2606_v8 = vld [vmem:[%s3726_s5 + $0x4] ss:$8 sps:$4 sm:$0xff]   ;;  %v158_v14 = vrot.slane %v153_v12, %v3301_v11  ;;  %v162_v15 = vrot.slane %v153_v12, %v3307_v13  ;;  %v2604_v30 = vld [vmem:[%s3726_s5] ss:$8 sps:$4 sm:$0xff]   ;;  %v2609_v31 = vld [vmem:[%s3726_s5 + $0x14] ss:$8 sps:$4 sm:$0xff]  }
  0x92   :  { %2389 = vmatprep.subr.bf16.mxu1 %v2600_v4  ;;  %v2607_v32 = vld [vmem:[%s3726_s5 + $0x10] ss:$8 sps:$4 sm:$0xff]   ;;  %v2612_v33 = vld [vmem:[%s3726_s5 + $0x24] ss:$8 sps:$4 sm:$0xff]   ;;  %v2610_v34 = vld [vmem:[%s3726_s5 + $0x20] ss:$8 sps:$4 sm:$0xff]  }
  0x93   :  { %754 = vmatpush1.bf16.msra.mxu0 %v2549_v35  ;;  %v2615_v35 = vld [vmem:[%s3726_s5 + $0x34] ss:$8 sps:$4 sm:$0xff]   ;;  %v2622_v1 = vld [vmem:[%s3728_s7 + $0x70] ss:$28 sps:$4 sm:$0xff]   ;;  %v2625_v3 = vld [vmem:[%s3728_s7 + $0xa8] ss:$28 sps:$4 sm:$0xff]  }
  0x94   :  { %755 = vmatprep.subr.bf16.mxu0 %v2554_v36  ;;  %v2613_v36 = vld [vmem:[%s3726_s5 + $0x30] ss:$8 sps:$4 sm:$0xff]   ;;  %v2630_v4 = vld [vmem:[%s3728_s7 + $0xe4] ss:$28 sps:$4 sm:$0xff]   ;;  %v2639_v12 = vld [vmem:[%s3728_s7 + $0x18c] ss:$28 sps:$4 sm:$0xff]  }
  0x95   :  { %2390 = vmatpush3.bf16.msra.mxu1 %v2601_v5  ;;  %v2624_v0 = vld [vmem:[%s3728_s7 + $0x74] ss:$28 sps:$4 sm:$0xff]   ;;  %v2628_v5 = vld [vmem:[%s3728_s7 + $0xe0] ss:$28 sps:$4 sm:$0xff]  }
  0x96   :  { %2391 = vmatprep.subr.bf16.mxu1 %v2602_v6  ;;  %v2633_v6 = vld [vmem:[%s3728_s7 + $0x11c] ss:$28 sps:$4 sm:$0xff]   ;;  %v2634_v9 = vld [vmem:[%s3728_s7 + $0x150] ss:$28 sps:$4 sm:$0xff]  }
  0x97   :  { %756 = vmatpush1.bf16.msra.mxu0 %v2552_v37  ;;  %v2618_v37 = vld [vmem:[%s3728_s7 + $0x4] ss:$28 sps:$4 sm:$0xff]  }
  0x98   :  { %757 = vmatprep.subr.bf16.mxu0 %v2557_v38  ;;  %v2643_v38 = vld [vmem:[%s3728_s7 + $0x1d8] ss:$28 sps:$4 sm:$0xff]  }
  0x99   :  { %2392 = vmatpush3.bf16.msra.mxu1 %v2603_v7  ;;  %v2631_v7 = vld [vmem:[%s3728_s7 + $0x118] ss:$28 sps:$4 sm:$0xff]  }
  0x9a   :  { %1080 = vmatprep.subr.bf16.mxu1 %v2606_v8  ;;  %v2636_v8 = vld [vmem:[%s3728_s7 + $0x154] ss:$28 sps:$4 sm:$0xff]  }
  0x9b   :  { %758 = vmatpush1.bf16.msra.mxu0 %v2555_v39  ;;  %v2644_v39 = vld [vmem:[%s3728_s7 + $0x18] ss:$28 sps:$4 sm:$0xff]  }
  0x9c   :  { %759 = vmatprep.subr.bf16.mxu0 %v2560_v40  ;;  %v2648_v40 = vld [vmem:[%s3728_s7 + $0x210] ss:$28 sps:$4 sm:$0xff]  }
  0x9f   :  { %760 = vmatpush1.bf16.msra.mxu0 %v2558_v41  ;;  %v2649_v41 = vld [vmem:[%s3728_s7 + $0x50] ss:$28 sps:$4 sm:$0xff]  }
  0xa0   :  { %761 = vmatprep.subr.bf16.mxu0 %v2563_v42  ;;  %v2653_v42 = vld [vmem:[%s3728_s7 + $0x248] ss:$28 sps:$4 sm:$0xff]  }
  0xa3   :  { %762 = vmatpush1.bf16.msra.mxu0 %v2561_v43  ;;  %v2654_v43 = vld [vmem:[%s3728_s7 + $0x88] ss:$28 sps:$4 sm:$0xff]  }
  0xa4   :  { %763 = vmatprep.subr.bf16.mxu0 %v2566_v44  ;;  %v2658_v44 = vld [vmem:[%s3728_s7 + $0x280] ss:$28 sps:$4 sm:$0xff]  }
  0xa7   :  { %764 = vmatpush1.bf16.msra.mxu0 %v2564_v45  ;;  %v2659_v45 = vld [vmem:[%s3728_s7 + $0xc0] ss:$28 sps:$4 sm:$0xff]  }
  0xa8   :  { %765 = vmatprep.subr.bf16.mxu0 %v2569_v46  ;;  %v2663_v46 = vld [vmem:[%s3728_s7 + $0x2b8] ss:$28 sps:$4 sm:$0xff]  }
  0xab   :  { %766 = vmatpush1.bf16.msra.mxu0 %v2567_v47  ;;  %v2664_v47 = vld [vmem:[%s3728_s7 + $0xf8] ss:$28 sps:$4 sm:$0xff]  }
  0xac   :  { %767 = vmatprep.subr.bf16.mxu0 %v2572_v48  ;;  %v2668_v48 = vld [vmem:[%s3728_s7 + $0x2f0] ss:$28 sps:$4 sm:$0xff]  }
  0xaf   :  { %768 = vmatpush1.bf16.msra.mxu0 %v2570_v49 }
  0xb0   :  { %769 = vmatprep.subr.bf16.mxu0 %v2575_v50  ;;  %v2239_v50 = vld [vmem:[%s3725_s4] ss:$0 sm:$0xff] }
  0xb3   :  { %770 = vmatpush1.bf16.msra.mxu0 %v2573_v51 }
  0xb4   :  { %771 = vmatprep.subr.bf16.mxu0 %v2578_v52 }
  0xb7   :  { %772 = vmatpush1.bf16.msra.mxu0 %v2576_v53 }
  0xb8   :  { %773 = vmatprep.subr.bf16.mxu0 %v2581_v54 }
  0xbb   :  { %774 = vmatpush1.bf16.msra.mxu0 %v2579_v55 }
  0xbc   :  { %775 = vmatprep.subr.bf16.mxu0 %v2584_v56 }
  0xbf   :  { %776 = vmatpush1.bf16.msra.mxu0 %v2582_v57 }
  0xc0   :  { %788 = vmatprep.subr.bf16.mxu0 %v2587_v60  ;;  %v2616_v60 = vld [vmem:[%s3728_s7] ss:$28 sps:$4 sm:$0xff]  }
  0xc2   :  { %778 = vmatmul.mubr.bf16.vlgmr.msra.gmra.mrb[0].mxu0 %v52_v61 }
  0xc3   :  { %789 = vmatpush1.bf16.msra.mxu0 %v2585_v62  ;;  %820 = vmatprep.mubr.bf16.mxu0 %v2856_v63  ;;  %v2621_v62 = vld [vmem:[%s3728_s7 + $0x3c] ss:$28 sps:$4 sm:$0xff]  }
  0xc4   :  { %2399 = vmatprep.subr.bf16.mxu0 %v2643_v38 }
  0xce   :  { %2238 = vmatmul.mubr.msk.bf16.vlgmr.msra.gmra.mrb[0].mxu0 %vm655_vm0, %v54_v2  ;;  %v2627_v2 = vld [vmem:[%s3728_s7 + $0xac] ss:$28 sps:$4 sm:$0xff]  }
  0xcf   :  { %2400 = vmatpush3.bf16.msra.mxu0 %v2644_v39 }
  0xd0   :  { %2401 = vmatprep.subr.bf16.mxu0 %v2648_v40 }
  0xd3   :  { %2402 = vmatpush3.bf16.msra.mxu0 %v2649_v41 }
  0xd4   :  { %2403 = vmatprep.subr.bf16.mxu0 %v2653_v42 }
  0xd7   :  { %2404 = vmatpush3.bf16.msra.mxu0 %v2654_v43 }
  0xd8   :  { %2405 = vmatprep.subr.bf16.mxu0 %v2658_v44 }
  0xdb   :  { %2406 = vmatpush3.bf16.msra.mxu0 %v2659_v45 }
  0xdc   :  { %2407 = vmatprep.subr.bf16.mxu0 %v2663_v46 }
  0xdf   :  { %2408 = vmatpush3.bf16.msra.mxu0 %v2664_v47 }
  0xe0   :  { %2409 = vmatprep.subr.bf16.mxu0 %v2668_v48 }
 0x1a1   :  { %v822_v16 = vpop.f32.mrb[0].mxu0 }
 0x1a2   :  { %v2421_v17 = vadd.f32 %v822_v16, %v158_v14  ;;  %v824_v18 = vpop.f32.mrb[1].mxu0  ;;  %v2640_v16 = vld [vmem:[%s3728_s7 + $0x1c0] ss:$28 sps:$4 sm:$0xff]  }
 0x1a3   :  { %v2422_v19 = vadd.f32 %v824_v18, %v162_v15  ;;  %v826_v20 = vpop.f32.mrb[2].mxu0  ;;  %v2645_v18 = vld [vmem:[%s3728_s7 + $0x1f8] ss:$28 sps:$4 sm:$0xff]  }
 0x1a4   :  { %v2423_v21 = vadd.f32 %v826_v20, %v158_v14  ;;  %v828_v22 = vpop.f32.mrb[3].mxu0  ;;  %v831_v24 = vmax.f32 %v2421_v17, 0.0  ;;  %v2637_v14 = vld [vmem:[%s3728_s7 + $0x188] ss:$28 sps:$4 sm:$0xff]   ;;  %v2647_v17 = vld [vmem:[%s3728_s7 + $0x1fc] ss:$28 sps:$4 sm:$0xff]  }
 0x1a5   :  { %v2424_v23 = vadd.f32 %v828_v22, %v162_v15  ;;  %v832_v26 = vmax.f32 %v2422_v19, 0.0  ;;  %v2642_v15 = vld [vmem:[%s3728_s7 + $0x1c4] ss:$28 sps:$4 sm:$0xff]   ;;  %v2652_v19 = vld [vmem:[%s3728_s7 + $0x234] ss:$28 sps:$4 sm:$0xff]  }
 0x1a6   :  { %v833_v25 = vmax.f32 %v2423_v21, 0.0  ;;  %v2650_v20 = vld [vmem:[%s3728_s7 + $0x230] ss:$28 sps:$4 sm:$0xff]   ;;  %v2655_v22 = vld [vmem:[%s3728_s7 + $0x268] ss:$28 sps:$4 sm:$0xff]  }
 0x1a7   :  { %v834_v27 = vmax.f32 %v2424_v23, 0.0  ;;  %v2657_v21 = vld [vmem:[%s3728_s7 + $0x26c] ss:$28 sps:$4 sm:$0xff]   ;;  %v2662_v23 = vld [vmem:[%s3728_s7 + $0x2a4] ss:$28 sps:$4 sm:$0xff]  }
 0x1a8   :  { %v835_v28 = vpack.c.bf16 %v833_v25, %v831_v24  ;;  %v2660_v24 = vld [vmem:[%s3728_s7 + $0x2a0] ss:$28 sps:$4 sm:$0xff]  }
 0x1a9   :  { %v836_v29 = vpack.c.bf16 %v834_v27, %v832_v26  ;;  %v2667_v25 = vld [vmem:[%s3728_s7 + $0x2dc] ss:$28 sps:$4 sm:$0xff]   ;;  %v2669_v27 = vld [vmem:[%s3728_s7 + $0x130] ss:$28 sps:$4 sm:$0xff]  }
 0x1aa   :  { %v2665_v26 = vld [vmem:[%s3728_s7 + $0x2d8] ss:$28 sps:$4 sm:$0xff]   ;;  %2410 = vmatpush3.bf16.msra.mxu0 %v2669_v27  ;;  %v2731_v27 = vld [vmem:[%s3728_s7 + $0x48] ss:$28 sps:$4 sm:$0xff]  }
 0x1ab   :  { %1004 = vmatprep.mubr.bf16.mxu1 %v836_v29  ;;  %v2670_v29 = vld [vmem:[%s3728_s7 + $0x310] ss:$28 sps:$4 sm:$0xff]  }
 0x1ac   :  { %1005 = vmatmul.mubr.bf16.vlgmr.msra.gmra.mrb[0].mxu1 %v835_v28  ;;  %v2672_v28 = vld [vmem:[%s3728_s7 + $0x314] ss:$28 sps:$4 sm:$0xff]  }
 0x1ad   :  { %1081 = vmatpush1.bf16.msra.mxu1 %v2604_v30  ;;  %1112 = vmatprep.mubr.bf16.mxu1 %v2856_v63  ;;  %v2619_v63 = vld [vmem:[%s3728_s7 + $0x38] ss:$28 sps:$4 sm:$0xff]   ;;  %v2673_v30 = vld [vmem:[%s3728_s7 + $0x328] ss:$28 sps:$4 sm:$0xff]  }
 0x1ae   :  { %1082 = vmatprep.subr.bf16.mxu1 %v2609_v31  ;;  %v2674_v31 = vld [vmem:[%s3728_s7 + $0x168] ss:$28 sps:$4 sm:$0xff]   ;;  %2411 = vmatprep.subr.bf16.mxu0 %v2673_v30  ;;  %v2739_v30 = vld [vmem:[%s3728_s7 + $0xbc] ss:$28 sps:$4 sm:$0xff]  }
 0x1af   :  { %2412 = vmatpush3.bf16.msra.mxu0 %v2674_v31  ;;  %v2737_v31 = vld [vmem:[%s3728_s7 + $0xb8] ss:$28 sps:$4 sm:$0xff]  }
 0x1b1   :  { %1083 = vmatpush1.bf16.msra.mxu1 %v2607_v32  ;;  %v2677_v32 = vld [vmem:[%s3728_s7 + $0x34c] ss:$28 sps:$4 sm:$0xff]  }
 0x1b2   :  { %1084 = vmatprep.subr.bf16.mxu1 %v2612_v33  ;;  %v2675_v33 = vld [vmem:[%s3728_s7 + $0x348] ss:$28 sps:$4 sm:$0xff]  }
 0x1b5   :  { %1085 = vmatpush1.bf16.msra.mxu1 %v2610_v34  ;;  %v2678_v34 = vld [vmem:[%s3728_s7 + $0x360] ss:$28 sps:$4 sm:$0xff]  }
 0x1b6   :  { %1086 = vmatprep.subr.bf16.mxu1 %v2615_v35  ;;  %v2679_v35 = vld [vmem:[%s3728_s7 + $0x1a0] ss:$28 sps:$4 sm:$0xff]   ;;  %2413 = vmatprep.subr.bf16.mxu0 %v2678_v34  ;;  %v2745_v34 = vld [vmem:[%s3728_s7 + $0x12c] ss:$28 sps:$4 sm:$0xff]  }
 0x1b7   :  { %2414 = vmatpush3.bf16.msra.mxu0 %v2679_v35  ;;  %v2743_v35 = vld [vmem:[%s3728_s7 + $0x128] ss:$28 sps:$4 sm:$0xff]  }
 0x1b9   :  { %1087 = vmatpush1.bf16.msra.mxu1 %v2613_v36  ;;  %v2682_v36 = vld [vmem:[%s3728_s7 + $0xc] ss:$28 sps:$4 sm:$0xff]  }
 0x1ba   :  { %1870 = vmatprep.subr.bf16.mxu1 %v2618_v37  ;;  %v1024_v37 = vld [vmem:[%s3727_s6] sm:$0x3] }
 0x1bb   :  { %v1029_v38 = vrot.slane %v1024_v37, %v3301_v11  ;;  %v1033_v39 = vrot.slane %v1024_v37, %v3307_v13  ;;  %v2746_v37 = vld [vmem:[%s3728_s7 + $0x160] ss:$28 sps:$4 sm:$0xff]  }
 0x27f   :  { %v2393_v49 = vpop.f32.mrb[0].mxu1 }
 0x280   :  { %v2394_v51 = vpop.f32.mrb[1].mxu1 }
 0x281   :  { %v2395_v52 = vadd.f32 %v2394_v51, %v2393_v49  ;;  %v2396_v53 = vpop.f32.mrb[2].mxu1 }
 0x282   :  { %v2397_v54 = vpop.f32.mrb[3].mxu1 }
 0x283   :  { %v1007_v55 = vadd.f32 %v2395_v52, %v2239_v50  ;;  %v2398_v56 = vadd.f32 %v2397_v54, %v2396_v53  ;;  %v2680_v54 = vld [vmem:[%s3728_s7 + $0x8] ss:$28 sps:$4 sm:$0xff]  }
 0x285   :  { %v1010_v57 = vadd.f32 %v2398_v56, %v2239_v50  ;;  %v1013_v58 = vmax.f32 %v1007_v55, 0.0  ;;  %v2685_v55 = vld [vmem:[%s3728_s7 + $0x44] ss:$28 sps:$4 sm:$0xff]  }
 0x286   :  { %v2683_v56 = vld [vmem:[%s3728_s7 + $0x40] ss:$28 sps:$4 sm:$0xff]  }
 0x287   :  { %v1014_v59 = vmax.f32 %v1010_v57, 0.0  ;;  %v2688_v57 = vld [vmem:[%s3728_s7 + $0x7c] ss:$28 sps:$4 sm:$0xff]  }
 0x289   :  { %v1015_v61 = vpack.c.bf16 %v1014_v59, %v1013_v58  ;;  %v2686_v58 = vld [vmem:[%s3728_s7 + $0x78] ss:$28 sps:$4 sm:$0xff]  }
 0x28a   :  { %v2691_v59 = vld [vmem:[%s3728_s7 + $0xb4] ss:$28 sps:$4 sm:$0xff]  }
 0x28b   :  { %2264 = vmatmul.mubr.msk.bf16.vlgmr.msra.gmra.mrb[4].mxu1 %vm1076_vm1, %v1015_v61  ;;  %v2694_v61 = vld [vmem:[%s3728_s7 + $0xec] ss:$28 sps:$4 sm:$0xff]  }
 0x28c   :  { %1871 = vmatpush1.bf16.msra.mxu1 %v2616_v60  ;;  %v2689_v60 = vld [vmem:[%s3728_s7 + $0xb0] ss:$28 sps:$4 sm:$0xff]  }
 0x28d   :  { %1872 = vmatprep.subr.bf16.mxu1 %v2621_v62  ;;  %v2692_v62 = vld [vmem:[%s3728_s7 + $0xe8] ss:$28 sps:$4 sm:$0xff]  }
 0x290   :  { %1873 = vmatpush1.bf16.msra.mxu1 %v2619_v63  ;;  %v2697_v63 = vld [vmem:[%s3728_s7 + $0x124] ss:$28 sps:$4 sm:$0xff]  }
 0x291   :  { %1874 = vmatprep.subr.bf16.mxu1 %v2624_v0  ;;  %v2695_v0 = vld [vmem:[%s3728_s7 + $0x120] ss:$28 sps:$4 sm:$0xff]  }
 0x294   :  { %1875 = vmatpush1.bf16.msra.mxu1 %v2622_v1  ;;  %v2700_v1 = vld [vmem:[%s3728_s7 + $0x15c] ss:$28 sps:$4 sm:$0xff]  }
 0x295   :  { %1876 = vmatprep.subr.bf16.mxu1 %v2627_v2  ;;  %v2698_v2 = vld [vmem:[%s3728_s7 + $0x158] ss:$28 sps:$4 sm:$0xff]  }
 0x298   :  { %1877 = vmatpush1.bf16.msra.mxu1 %v2625_v3  ;;  %v2703_v3 = vld [vmem:[%s3728_s7 + $0x194] ss:$28 sps:$4 sm:$0xff]  }
 0x299   :  { %1878 = vmatprep.subr.bf16.mxu1 %v2630_v4  ;;  %v2701_v4 = vld [vmem:[%s3728_s7 + $0x190] ss:$28 sps:$4 sm:$0xff]  }
 0x29c   :  { %1879 = vmatpush1.bf16.msra.mxu1 %v2628_v5  ;;  %v2706_v5 = vld [vmem:[%s3728_s7 + $0x1cc] ss:$28 sps:$4 sm:$0xff]  }
 0x29d   :  { %1880 = vmatprep.subr.bf16.mxu1 %v2633_v6  ;;  %v2704_v6 = vld [vmem:[%s3728_s7 + $0x1c8] ss:$28 sps:$4 sm:$0xff]  }
 0x2a0   :  { %1881 = vmatpush1.bf16.msra.mxu1 %v2631_v7  ;;  %v2709_v7 = vld [vmem:[%s3728_s7 + $0x204] ss:$28 sps:$4 sm:$0xff]  }
 0x2a1   :  { %1882 = vmatprep.subr.bf16.mxu1 %v2636_v8  ;;  %v2707_v8 = vld [vmem:[%s3728_s7 + $0x200] ss:$28 sps:$4 sm:$0xff]  }
 0x2a4   :  { %1883 = vmatpush1.bf16.msra.mxu1 %v2634_v9  ;;  %v2712_v9 = vld [vmem:[%s3728_s7 + $0x23c] ss:$28 sps:$4 sm:$0xff]  }
 0x2a5   :  { %1884 = vmatprep.subr.bf16.mxu1 %v2639_v12  ;;  %v2710_v12 = vld [vmem:[%s3728_s7 + $0x238] ss:$28 sps:$4 sm:$0xff]  }
 0x2a8   :  { %1885 = vmatpush1.bf16.msra.mxu1 %v2637_v14  ;;  %v2715_v14 = vld [vmem:[%s3728_s7 + $0x274] ss:$28 sps:$4 sm:$0xff]  }
 0x2a9   :  { %1886 = vmatprep.subr.bf16.mxu1 %v2642_v15  ;;  %v2713_v15 = vld [vmem:[%s3728_s7 + $0x270] ss:$28 sps:$4 sm:$0xff]  }
 0x2ac   :  { %1887 = vmatpush1.bf16.msra.mxu1 %v2640_v16  ;;  %v2718_v16 = vld [vmem:[%s3728_s7 + $0x2ac] ss:$28 sps:$4 sm:$0xff]  }
 0x2ad   :  { %1888 = vmatprep.subr.bf16.mxu1 %v2647_v17  ;;  %v2716_v17 = vld [vmem:[%s3728_s7 + $0x2a8] ss:$28 sps:$4 sm:$0xff]  }
 0x2b0   :  { %1889 = vmatpush1.bf16.msra.mxu1 %v2645_v18  ;;  %v2721_v18 = vld [vmem:[%s3728_s7 + $0x2e4] ss:$28 sps:$4 sm:$0xff]  }
 0x2b1   :  { %1890 = vmatprep.subr.bf16.mxu1 %v2652_v19  ;;  %v2719_v19 = vld [vmem:[%s3728_s7 + $0x2e0] ss:$28 sps:$4 sm:$0xff]  }
 0x2b4   :  { %1891 = vmatpush1.bf16.msra.mxu1 %v2650_v20  ;;  %v2724_v20 = vld [vmem:[%s3728_s7 + $0x31c] ss:$28 sps:$4 sm:$0xff]  }
 0x2b5   :  { %1892 = vmatprep.subr.bf16.mxu1 %v2657_v21  ;;  %v2722_v21 = vld [vmem:[%s3728_s7 + $0x318] ss:$28 sps:$4 sm:$0xff]  }
 0x2b8   :  { %1893 = vmatpush1.bf16.msra.mxu1 %v2655_v22  ;;  %v2727_v22 = vld [vmem:[%s3728_s7 + $0x354] ss:$28 sps:$4 sm:$0xff]  }
 0x2b9   :  { %1894 = vmatprep.subr.bf16.mxu1 %v2662_v23  ;;  %v2725_v23 = vld [vmem:[%s3728_s7 + $0x350] ss:$28 sps:$4 sm:$0xff]  }
 0x2bc   :  { %1895 = vmatpush1.bf16.msra.mxu1 %v2660_v24  ;;  %v2730_v24 = vld [vmem:[%s3728_s7 + $0x14] ss:$28 sps:$4 sm:$0xff]  }
 0x2bd   :  { %1896 = vmatprep.subr.bf16.mxu1 %v2667_v25  ;;  %v2728_v25 = vld [vmem:[%s3728_s7 + $0x10] ss:$28 sps:$4 sm:$0xff]  }
 0x2c0   :  { %1897 = vmatpush1.bf16.msra.mxu1 %v2665_v26  ;;  %v2733_v26 = vld [vmem:[%s3728_s7 + $0x4c] ss:$28 sps:$4 sm:$0xff]  }
 0x2c1   :  { %1898 = vmatprep.subr.bf16.mxu1 %v2672_v28  ;;  %v2736_v28 = vld [vmem:[%s3728_s7 + $0x84] ss:$28 sps:$4 sm:$0xff]  }
 0x2c4   :  { %1899 = vmatpush1.bf16.msra.mxu1 %v2670_v29  ;;  %v2734_v29 = vld [vmem:[%s3728_s7 + $0x80] ss:$28 sps:$4 sm:$0xff]  }
 0x2c5   :  { %1900 = vmatprep.subr.bf16.mxu1 %v2677_v32  ;;  %v2742_v32 = vld [vmem:[%s3728_s7 + $0xf4] ss:$28 sps:$4 sm:$0xff]  }
 0x2c8   :  { %1901 = vmatpush1.bf16.msra.mxu1 %v2675_v33  ;;  %v2740_v33 = vld [vmem:[%s3728_s7 + $0xf0] ss:$28 sps:$4 sm:$0xff]  }
 0x2c9   :  { %1913 = vmatprep.subr.bf16.mxu1 %v2682_v36  ;;  %v2748_v36 = vld [vmem:[%s3728_s7 + $0x164] ss:$28 sps:$4 sm:$0xff]  }
 0x35e   :  { %v1114_v40 = vpop.f32.mrb[4].mxu1 }
 0x35f   :  { %v1115_v41 = vadd.f32 %v1114_v40, %v1029_v38  ;;  %v1116_v42 = vpop.f32.mrb[5].mxu1  ;;  %v2754_v40 = vld [vmem:[%s3728_s7 + $0x1d4] ss:$28 sps:$4 sm:$0xff]  }
 0x360   :  { %v1117_v43 = vadd.f32 %v1116_v42, %v1033_v39  ;;  %v1118_v44 = vpop.f32.mrb[6].mxu1  ;;  %v2757_v42 = vld [vmem:[%s3728_s7 + $0x20c] ss:$28 sps:$4 sm:$0xff]  }
 0x361   :  { %v1119_v45 = vadd.f32 %v1118_v44, %v1029_v38  ;;  %v1120_v46 = vpop.f32.mrb[7].mxu1  ;;  %v1123_v48 = vmax.f32 %v1115_v41, 0.0  ;;  %v2751_v38 = vld [vmem:[%s3728_s7 + $0x19c] ss:$28 sps:$4 sm:$0xff]   ;;  %v2752_v41 = vld [vmem:[%s3728_s7 + $0x1d0] ss:$28 sps:$4 sm:$0xff]  }
 0x362   :  { %v1121_v47 = vadd.f32 %v1120_v46, %v1033_v39  ;;  %v1124_v50 = vmax.f32 %v1117_v43, 0.0  ;;  %v2749_v39 = vld [vmem:[%s3728_s7 + $0x198] ss:$28 sps:$4 sm:$0xff]   ;;  %v2755_v43 = vld [vmem:[%s3728_s7 + $0x208] ss:$28 sps:$4 sm:$0xff]  }
 0x363   :  { %v1125_v49 = vmax.f32 %v1119_v45, 0.0  ;;  %v2760_v44 = vld [vmem:[%s3728_s7 + $0x244] ss:$28 sps:$4 sm:$0xff]   ;;  %v2763_v46 = vld [vmem:[%s3728_s7 + $0x27c] ss:$28 sps:$4 sm:$0xff]  }
 0x364   :  { %v1126_v51 = vmax.f32 %v1121_v47, 0.0  ;;  %v2758_v45 = vld [vmem:[%s3728_s7 + $0x240] ss:$28 sps:$4 sm:$0xff]   ;;  %v2761_v47 = vld [vmem:[%s3728_s7 + $0x278] ss:$28 sps:$4 sm:$0xff]  }
 0x365   :  { %v3487_v52 = vpack.c.bf16 %v1125_v49, %v1123_v48  ;;  %v2766_v48 = vld [vmem:[%s3728_s7 + $0x2b4] ss:$28 sps:$4 sm:$0xff]  }
 0x366   :  { %v3489_v53 = vpack.c.bf16 %v1126_v51, %v1124_v50  ;;  %v2764_v49 = vld [vmem:[%s3728_s7 + $0x2b0] ss:$28 sps:$4 sm:$0xff]   ;;  %v2767_v51 = vld [vmem:[%s3728_s7 + $0x2e8] ss:$28 sps:$4 sm:$0xff]  }
 0x367   :  { %v2769_v50 = vld [vmem:[%s3728_s7 + $0x2ec] ss:$28 sps:$4 sm:$0xff]  }
 0x368   :  { %1902 = vmatprep.mubr.bf16.mxu1 %v3489_v53  ;;  %2031 = vmatprep.mubr.bf16.mxu0 %v3489_v53 }
 0x369   :  { %1903 = vmatmul.mubr.bf16.vlgmr.msra.gmra.mrb[8].mxu1 %v3487_v52  ;;  %2032 = vmatmul.mubr.bf16.vlgmr.msra.gmra.mrb[4].mxu0 %v3487_v52 }
 0x36a   :  { %1914 = vmatpush1.bf16.msra.mxu1 %v2680_v54  ;;  %1945 = vmatprep.mubr.bf16.mxu1 %v3489_v53  ;;  %v2770_v54 = vld [vmem:[%s3728_s7 + $0x320] ss:$28 sps:$4 sm:$0xff]  }
 0x36b   :  { %1915 = vmatprep.subr.bf16.mxu1 %v2685_v55  ;;  %v2775_v55 = vld [vmem:[%s3728_s7 + $0x35c] ss:$28 sps:$4 sm:$0xff]  }
 0x36e   :  { %1916 = vmatpush1.bf16.msra.mxu1 %v2683_v56  ;;  %v2773_v56 = vld [vmem:[%s3728_s7 + $0x358] ss:$28 sps:$4 sm:$0xff]  }
 0x36f   :  { %1917 = vmatprep.subr.bf16.mxu1 %v2688_v57  ;;  %v3691_v57 = vld [vmem:[%s3729_s8] sm:$0x7f] }
 0x372   :  { %1918 = vmatpush1.bf16.msra.mxu1 %v2686_v58  ;;  %v1285_v58 = vsub.s32 6, %v3298_v10 }
 0x373   :  { %1919 = vmatprep.subr.bf16.mxu1 %v2691_v59  ;;  %v1262_v59 = vrot.slane %v3691_v57, %v3301_v11 }
 0x376   :  { %1920 = vmatpush1.bf16.msra.mxu1 %v2689_v60  ;;  %v1266_v60 = vrot.slane %v3691_v57, %v3307_v13 }
 0x377   :  { %1921 = vmatprep.subr.bf16.mxu1 %v2694_v61 }
 0x37a   :  { %1922 = vmatpush1.bf16.msra.mxu1 %v2692_v62 }
 0x37b   :  { %1923 = vmatprep.subr.bf16.mxu1 %v2697_v63  ;;  %v1286_v63 = vrot.slane %v3691_v57, %v1285_v58 }
 0x37e   :  { %1924 = vmatpush1.bf16.msra.mxu1 %v2695_v0 }
 0x37f   :  { %1925 = vmatprep.subr.bf16.mxu1 %v2700_v1 }
 0x382   :  { %1926 = vmatpush1.bf16.msra.mxu1 %v2698_v2 }
 0x383   :  { %1927 = vmatprep.subr.bf16.mxu1 %v2703_v3 }
 0x386   :  { %1928 = vmatpush1.bf16.msra.mxu1 %v2701_v4 }
 0x387   :  { %1929 = vmatprep.subr.bf16.mxu1 %v2706_v5 }
 0x38a   :  { %1930 = vmatpush1.bf16.msra.mxu1 %v2704_v6 }
 0x38b   :  { %1931 = vmatprep.subr.bf16.mxu1 %v2709_v7 }
 0x38e   :  { %1932 = vmatpush1.bf16.msra.mxu1 %v2707_v8 }
 0x38f   :  { %1933 = vmatprep.subr.bf16.mxu1 %v2712_v9 }
 0x392   :  { %1934 = vmatpush1.bf16.msra.mxu1 %v2710_v12 }
 0x393   :  { %1935 = vmatprep.subr.bf16.mxu1 %v2715_v14 }
 0x396   :  { %1936 = vmatpush1.bf16.msra.mxu1 %v2713_v15 }
 0x397   :  { %1937 = vmatprep.subr.bf16.mxu1 %v2718_v16 }
 0x39a   :  { %1938 = vmatpush1.bf16.msra.mxu1 %v2716_v17 }
 0x39b   :  { %1939 = vmatprep.subr.bf16.mxu1 %v2721_v18 }
 0x39e   :  { %1940 = vmatpush1.bf16.msra.mxu1 %v2719_v19 }
 0x39f   :  { %1941 = vmatprep.subr.bf16.mxu1 %v2724_v20 }
 0x3a2   :  { %1942 = vmatpush1.bf16.msra.mxu1 %v2722_v21 }
 0x3a3   :  { %1943 = vmatprep.subr.bf16.mxu1 %v2727_v22 }
 0x3a6   :  { %1944 = vmatpush1.bf16.msra.mxu1 %v2725_v23 }
 0x3a7   :  { %1956 = vmatprep.subr.bf16.mxu1 %v2730_v24 }
 0x3a9   :  { %1946 = vmatmul.mubr.bf16.vlgmr.msra.gmra.mrb[12].mxu1 %v3487_v52 }
 0x3aa   :  { %1957 = vmatpush1.bf16.msra.mxu1 %v2728_v25  ;;  %1988 = vmatprep.mubr.bf16.mxu1 %v3489_v53  ;;  %v2772_v53 = vld [vmem:[%s3728_s7 + $0x324] ss:$28 sps:$4 sm:$0xff]   ;;  %s2857_s7 = smov [#allocation2]  }
 0x3ab   :  { %1958 = vmatprep.subr.bf16.mxu1 %v2733_v26  ;;  %s2129_s8 = sshll.u32 %s2857_s7, 4  ;;  %s2130_s8 = int_to_ptr.vmem [resolvable:$true] %s2129_s8 }
 0x3ac   :  { %s2832_s12 = scalar_lea.vmem %s2130_s8, 1792  ;;  %p2837_p1 = scmp.lt.s32.totalorder %s2130_s8, %s2130_s8 }
 0x3ad   :  { %p2833_p0 = scmp.ne.s32.totalorder %s2130_s8, %s2832_s12  ;;  %p2838_p2 = scmp.lt.s32.totalorder %s2832_s12, %s2832_s12 }
 0x3ae   :  { %1959 = vmatpush1.bf16.msra.mxu1 %v2731_v27 }
 0x3af   :  { %1960 = vmatprep.subr.bf16.mxu1 %v2736_v28  ;;  %p2839_p3 = por %p2838_p2, %p2837_p1 }
 0x3b1   :  { %p2840_p4 = pnand %p2839_p3, %p2833_p0 }
 0x3b2   :  { %1961 = vmatpush1.bf16.msra.mxu1 %v2734_v29 }
 0x3b3   :  { %1962 = vmatprep.subr.bf16.mxu1 %v2739_v30 }
 0x3b6   :  { %1963 = vmatpush1.bf16.msra.mxu1 %v2737_v31 }
 0x3b7   :  { %1964 = vmatprep.subr.bf16.mxu1 %v2742_v32 }
 0x3ba   :  { %1965 = vmatpush1.bf16.msra.mxu1 %v2740_v33 }
 0x3bb   :  { %1966 = vmatprep.subr.bf16.mxu1 %v2745_v34 }
 0x3be   :  { %1967 = vmatpush1.bf16.msra.mxu1 %v2743_v35 }
 0x3bf   :  { %1968 = vmatprep.subr.bf16.mxu1 %v2748_v36 }
 0x3c2   :  { %1969 = vmatpush1.bf16.msra.mxu1 %v2746_v37 }
 0x3c3   :  { %1970 = vmatprep.subr.bf16.mxu1 %v2751_v38 }
 0x3c6   :  { %1971 = vmatpush1.bf16.msra.mxu1 %v2749_v39 }
 0x3c7   :  { %1972 = vmatprep.subr.bf16.mxu1 %v2754_v40 }
 0x3ca   :  { %1973 = vmatpush1.bf16.msra.mxu1 %v2752_v41 }
 0x3cb   :  { %1974 = vmatprep.subr.bf16.mxu1 %v2757_v42 }
 0x3ce   :  { %1975 = vmatpush1.bf16.msra.mxu1 %v2755_v43 }
 0x3cf   :  { %1976 = vmatprep.subr.bf16.mxu1 %v2760_v44  ;;  %v1269_v44 = vsub.s32 2, %v3298_v10 }
 0x3d2   :  { %1977 = vmatpush1.bf16.msra.mxu1 %v2758_v45  ;;  %v1273_v45 = vsub.s32 3, %v3298_v10 }
 0x3d3   :  { %1978 = vmatprep.subr.bf16.mxu1 %v2763_v46  ;;  %v1270_v46 = vrot.slane %v3691_v57, %v1269_v44 }
 0x3d6   :  { %1979 = vmatpush1.bf16.msra.mxu1 %v2761_v47  ;;  %v1274_v47 = vrot.slane %v3691_v57, %v1273_v45 }
 0x3d7   :  { %1980 = vmatprep.subr.bf16.mxu1 %v2766_v48 }
 0x3da   :  { %1981 = vmatpush1.bf16.msra.mxu1 %v2764_v49 }
 0x3db   :  { %1982 = vmatprep.subr.bf16.mxu1 %v2769_v50 }
 0x3de   :  { %1983 = vmatpush1.bf16.msra.mxu1 %v2767_v51 }
 0x3df   :  { %1984 = vmatprep.subr.bf16.mxu1 %v2772_v53 }
 0x3e2   :  { %1985 = vmatpush1.bf16.msra.mxu1 %v2770_v54 }
 0x3e3   :  { %1986 = vmatprep.subr.bf16.mxu1 %v2775_v55 }
 0x3e6   :  { %1987 = vmatpush1.bf16.msra.mxu1 %v2773_v56 }
 0x3e9   :  { %1989 = vmatmul.mubr.bf16.vlgmr.msra.gmra.mrb[16].mxu1 %v3487_v52 }
 0x43c   :  { %v1904_v61 = vpop.f32.mrb[8].mxu1  ;;  %v2415_v62 = vpop.f32.mrb[4].mxu0 }
 0x43d   :  { %v1905_v0 = vadd.f32 %v1904_v61, %v1262_v59  ;;  %v1906_v1 = vpop.f32.mrb[9].mxu1  ;;  %v2416_v52 = vpop.f32.mrb[5].mxu0 }
 0x43e   :  { %v1907_v2 = vadd.f32 %v1906_v1, %v1266_v60  ;;  %v2417_v3 = vadd.f32 %v2416_v52, %v2415_v62  ;;  %v1908_v4 = vpop.f32.mrb[10].mxu1  ;;  %v2418_v5 = vpop.f32.mrb[6].mxu0 }
 0x43f   :  { %v2040_v6 = vsub.f32 0.0, %v1905_v0  ;;  %v1909_v7 = vadd.f32 %v1908_v4, %v1262_v59  ;;  %v1910_v8 = vpop.f32.mrb[11].mxu1  ;;  %v2419_v9 = vpop.f32.mrb[7].mxu0 }
 0x440   :  { %v2041_v12 = vsub.f32 0.0, %v1907_v2  ;;  %v2034_v11 = vadd.f32 %v2417_v3, %v1286_v63  ;;  %v1911_v14 = vadd.f32 %v1910_v8, %v1266_v60  ;;  %v2420_v15 = vadd.f32 %v2419_v9, %v2418_v5 }
 0x441   :  { %v2054_v13 = vmul.f32 1.442695, %v2040_v6  ;;  %v2047_v16 = vsub.f32 0.0, %v1909_v7 }
 0x442   :  { %v2056_v17 = vmul.f32 1.442695, %v2041_v12  ;;  %v2046_v18 = vsub.f32 0.0, %v2034_v11  ;;  %v2048_v19 = vsub.f32 0.0, %v1911_v14  ;;  %v2037_v20 = vadd.f32 %v2420_v15, %v1286_v63 }
 0x443   :  { %2776 = vpow2.f32 %v2054_v13  ;;  %v2068_v21 = vmul.f32 1.442695, %v2047_v16  ;;  %v1277_v15 = vsub.s32 4, %v3298_v10  ;;  %v1281_v13 = vsub.s32 5, %v3298_v10 }
 0x444   :  { %2778 = vpow2.f32 %v2056_v17  ;;  %v2066_v22 = vmul.f32 1.442695, %v2046_v18  ;;  %v2070_v23 = vmul.f32 1.442695, %v2048_v19  ;;  %v2053_v24 = vsub.f32 0.0, %v2037_v20 }
 0x445   :  { %2780 = vpow2.f32 %v2068_v21  ;;  %v1278_v16 = vrot.slane %v3691_v57, %v1277_v15  ;;  %v1282_v17 = vrot.slane %v3691_v57, %v1281_v13 }
 0x446   :  { %2782 = vpow2.f32 %v2066_v22  ;;  %v2080_v25 = vmul.f32 1.442695, %v2053_v24 }
 0x447   :  { %2784 = vpow2.f32 %v2070_v23 }
 0x448   :  { %2786 = vpow2.f32 %v2080_v25 }
 0x44d   :  { %v2777_v26 = vpop.eup %2776 }
 0x44e   :  { %v2779_v27 = vpop.eup %2778  ;;  %v2082_v28 = vadd.f32 1.0, %v2777_v26 }
 0x44f   :  { %v2781_v29 = vpop.eup %2780  ;;  %v2083_v30 = vadd.f32 1.0, %v2779_v27 }
 0x450   :  { %v2783_v31 = vpop.eup %2782  ;;  %2788 = vrcp.f32 %v2082_v28  ;;  %v2089_v32 = vadd.f32 1.0, %v2781_v29 }
 0x451   :  { %v2785_v33 = vpop.eup %2784  ;;  %2790 = vrcp.f32 %v2083_v30  ;;  %v2088_v34 = vadd.f32 1.0, %v2783_v31 }
 0x452   :  { %v2787_v35 = vpop.eup %2786  ;;  %2792 = vrcp.f32 %v2089_v32  ;;  %v2090_v36 = vadd.f32 1.0, %v2785_v33 }
 0x453   :  { %2794 = vrcp.f32 %v2088_v34  ;;  %v2095_v37 = vadd.f32 1.0, %v2787_v35 }
 0x454   :  { %2796 = vrcp.f32 %v2090_v36 }
 0x455   :  { %2798 = vrcp.f32 %v2095_v37 }
 0x45a   :  { %v2789_v38 = vpop.eup %2788 }
 0x45b   :  { %v2791_v39 = vpop.eup %2790  ;;  %2110 = vst [vmem:[#allocation2] sm:$0xff] %v2789_v38 }
 0x45c   :  { %v2793_v40 = vpop.eup %2792  ;;  %2111 = vst [vmem:[#allocation2 + $0x8] sm:$0xff] %v2791_v39 }
 0x45d   :  { %v2795_v41 = vpop.eup %2794  ;;  %2117 = vst [vmem:[#allocation2 + $0x38] sm:$0xff] %v2793_v40 }
 0x45e   :  { %v2797_v42 = vpop.eup %2796  ;;  %2116 = vst.msk [vmem:[#allocation2 + $0x30] sm:$0xff] %vm655_vm0, %v2795_v41 }
 0x45f   :  { %v2799_v43 = vpop.eup %2798  ;;  %2118 = vst [vmem:[#allocation2 + $0x40] sm:$0xff] %v2797_v42 }
 0x460   :  { %2123 = vst.msk [vmem:[#allocation2 + $0x68] sm:$0xff] %vm655_vm0, %v2799_v43 }
 0x47c   :  { %v1947_v48 = vpop.f32.mrb[12].mxu1 }
 0x47d   :  { %v1948_v49 = vadd.f32 %v1947_v48, %v1270_v46  ;;  %v1949_v50 = vpop.f32.mrb[13].mxu1 }
 0x47e   :  { %v1950_v51 = vadd.f32 %v1949_v50, %v1274_v47  ;;  %v1951_v53 = vpop.f32.mrb[14].mxu1 }
 0x47f   :  { %v2042_v54 = vsub.f32 0.0, %v1948_v49  ;;  %v1952_v55 = vadd.f32 %v1951_v53, %v1270_v46  ;;  %v1953_v56 = vpop.f32.mrb[15].mxu1 }
 0x480   :  { %v2043_v58 = vsub.f32 0.0, %v1950_v51  ;;  %v1954_v59 = vadd.f32 %v1953_v56, %v1274_v47 }
 0x481   :  { %v2058_v60 = vmul.f32 1.442695, %v2042_v54  ;;  %v2049_v61 = vsub.f32 0.0, %v1952_v55 }
 0x482   :  { %v2060_v62 = vmul.f32 1.442695, %v2043_v58  ;;  %v2050_v63 = vsub.f32 0.0, %v1954_v59 }
 0x483   :  { %2800 = vpow2.f32 %v2058_v60  ;;  %v2072_v0 = vmul.f32 1.442695, %v2049_v61 }
 0x484   :  { %2802 = vpow2.f32 %v2060_v62  ;;  %v2074_v1 = vmul.f32 1.442695, %v2050_v63 }
 0x485   :  { %2804 = vpow2.f32 %v2072_v0 }
 0x486   :  { %2806 = vpow2.f32 %v2074_v1 }
 0x48d   :  { %v2801_v52 = vpop.eup %2800 }
 0x48e   :  { %v2803_v2 = vpop.eup %2802  ;;  %v2084_v3 = vadd.f32 1.0, %v2801_v52 }
 0x48f   :  { %v2805_v4 = vpop.eup %2804  ;;  %v2085_v5 = vadd.f32 1.0, %v2803_v2 }
 0x490   :  { %v2807_v6 = vpop.eup %2806  ;;  %2808 = vrcp.f32 %v2084_v3  ;;  %v2091_v7 = vadd.f32 1.0, %v2805_v4 }
 0x491   :  { %2810 = vrcp.f32 %v2085_v5  ;;  %v2092_v8 = vadd.f32 1.0, %v2807_v6 }
 0x492   :  { %2812 = vrcp.f32 %v2091_v7 }
 0x493   :  { %2814 = vrcp.f32 %v2092_v8 }
 0x49a   :  { %v2809_v9 = vpop.eup %2808 }
 0x49b   :  { %v2811_v12 = vpop.eup %2810  ;;  %2112 = vst [vmem:[#allocation2 + $0x10] sm:$0xff] %v2809_v9 }
 0x49c   :  { %v2813_v11 = vpop.eup %2812  ;;  %2113 = vst [vmem:[#allocation2 + $0x18] sm:$0xff] %v2811_v12 }
 0x49d   :  { %v2815_v14 = vpop.eup %2814  ;;  %2119 = vst [vmem:[#allocation2 + $0x48] sm:$0xff] %v2813_v11 }
 0x49e   :  { %2120 = vst [vmem:[#allocation2 + $0x50] sm:$0xff] %v2815_v14 }
 0x4bc   :  { %v1990_v18 = vpop.f32.mrb[16].mxu1 }
 0x4bd   :  { %v1991_v19 = vadd.f32 %v1990_v18, %v1278_v16  ;;  %v1992_v20 = vpop.f32.mrb[17].mxu1 }
 0x4be   :  { %v1993_v21 = vadd.f32 %v1992_v20, %v1282_v17  ;;  %v1994_v22 = vpop.f32.mrb[18].mxu1 }
 0x4bf   :  { %v2044_v23 = vsub.f32 0.0, %v1991_v19  ;;  %v1995_v24 = vadd.f32 %v1994_v22, %v1278_v16  ;;  %v1996_v25 = vpop.f32.mrb[19].mxu1 }
 0x4c0   :  { %v2045_v26 = vsub.f32 0.0, %v1993_v21  ;;  %v1997_v27 = vadd.f32 %v1996_v25, %v1282_v17 }
 0x4c1   :  { %v2062_v28 = vmul.f32 1.442695, %v2044_v23  ;;  %v2051_v29 = vsub.f32 0.0, %v1995_v24 }
 0x4c2   :  { %v2064_v30 = vmul.f32 1.442695, %v2045_v26  ;;  %v2052_v31 = vsub.f32 0.0, %v1997_v27 }
 0x4c3   :  { %2816 = vpow2.f32 %v2062_v28  ;;  %v2076_v10 = vmul.f32 1.442695, %v2051_v29 }
 0x4c4   :  { %2818 = vpow2.f32 %v2064_v30  ;;  %v2078_v32 = vmul.f32 1.442695, %v2052_v31 }
 0x4c5   :  { %2820 = vpow2.f32 %v2076_v10 }
 0x4c6   :  { %2822 = vpow2.f32 %v2078_v32 }
 0x4cd   :  { %v2817_v57 = vpop.eup %2816 }
 0x4ce   :  { %v2819_v33 = vpop.eup %2818  ;;  %v2086_v34 = vadd.f32 1.0, %v2817_v57 }
 0x4cf   :  { %v2821_v35 = vpop.eup %2820  ;;  %v2087_v36 = vadd.f32 1.0, %v2819_v33 }
 0x4d0   :  { %v2823_v37 = vpop.eup %2822  ;;  %2824 = vrcp.f32 %v2086_v34  ;;  %v2093_v38 = vadd.f32 1.0, %v2821_v35 }
 0x4d1   :  { %2826 = vrcp.f32 %v2087_v36  ;;  %v2094_v39 = vadd.f32 1.0, %v2823_v37 }
 0x4d2   :  { %2828 = vrcp.f32 %v2093_v38 }
 0x4d3   :  { %2830 = vrcp.f32 %v2094_v39 }
 0x4da   :  { %v2825_v40 = vpop.eup %2824 }
 0x4db   :  { %v2827_v41 = vpop.eup %2826  ;;  %2114 = vst [vmem:[#allocation2 + $0x20] sm:$0xff] %v2825_v40 }
 0x4dc   :  { %v2829_v42 = vpop.eup %2828  ;;  %2115 = vst [vmem:[#allocation2 + $0x28] sm:$0xff] %v2827_v41 }
 0x4dd   :  { %v2831_v43 = vpop.eup %2830  ;;  %2121 = vst [vmem:[#allocation2 + $0x58] sm:$0xff] %v2829_v42 }
 0x4de   :  { %2122 = vst [vmem:[#allocation2 + $0x60] sm:$0xff] %v2831_v43 }
 0x4df   :  { %2843 = shalt.err (!%p2840_p4)
}
 0x4e0   :  { %s2844_s2 = scalar_lea.hbm %s3730_s9, 1792 }
 0x4e1   :  { %p2845_p5 = scmp.ne.s32.totalorder %s3730_s9, %s2844_s2  ;;  %p2848_p6 = scmp.lt.u32.totalorder %s2844_s2, %s3730_s9 }
 0x4e3   :  { %p2850_p7 = pnand %p2848_p6, %p2845_p5 }
 0x4e5   :  { %2853 = shalt.err (!%p2850_p7)
}
 0x4e6   :  { %s2858_s18 = smov 896   ;;  %s2859_s19 = smov 56  }
 0x4e7   :  { %2135 = dma.vmem_to_hbm [thread:$0]  %s2130_s8, 1792, %s3730_s9, [#allocation3], %s2858_s18, %s2858_s18, %s2859_s19  }
 0x4e8   :  { %2854 = dma.done.wait [#allocation3], 1792  }
 0x4e9   :  { %2855 = vsyncadd [#allocation3], 4294965504 }
 0x4ea   :  { %2139 = vsyncpa [#allocation3], 1 }

</bundles_post_ra>
